<compile_context>
chip_gen: v6e
topology: v6e:2x2x1
jax: 0.10.0
libtpu: 0.0.40
codegen_flags: <defaults>
</compile_context>

<pallas_src>
import functools

import jax
import jax.numpy as jnp
from jax.experimental import pallas as pl
from jax.experimental.pallas import tpu as pltpu

LN_EPS = 1e-5   # torch.nn.LayerNorm default


# ----------------------------------------------------------------------------
# Hardware-aware sizing helpers
# ----------------------------------------------------------------------------
def _round_up(x, m):
    return ((x + m - 1) // m) * m


@functools.lru_cache(maxsize=1)
def _vmem_limit_bytes():
    """Generation-dependent VMEM budget: ~56 MiB on v7x (64 MiB physical),
    ~104-112 MiB on v5e/v6e (128 MiB physical). Safe 56 MiB fallback."""
    phys = 64 * 1024 * 1024
    try:
        info = pltpu.get_tpu_info()
        for attr in ("vmem_capacity_bytes", "vmem_size_bytes", "vmem_bytes"):
            v = getattr(info, attr, None)
            if v:
                phys = int(v)
                break
    except Exception:
        pass
    if phys <= 64 * 1024 * 1024:
        return phys - 8 * 1024 * 1024
    return min(phys - 24 * 1024 * 1024, 112 * 1024 * 1024)


def _layer_step_bytes(tm, tk, hidden, x_bytes=2, w_bytes=2):
    io = 2 * 2 * tm * hidden * x_bytes          # x-in + out tiles, double-buffered
    w = 2 * 3 * hidden * tk * w_bytes           # gate/up/down tiles, double-buffered
    scratch = tm * hidden * (2 + 4)             # bf16 LN cache + f32 accumulator
    temps = 3 * tm * tk * 4                     # gate/up/inter f32 temporaries
    return io + w + scratch + temps


def _head_step_bytes(tm, tv, hidden, out_bytes=4, x_bytes=2, w_bytes=2):
    io = 2 * tm * hidden * x_bytes + 2 * tm * tv * out_bytes
    w = 2 * hidden * tv * w_bytes + 2 * tv * 4
    temps = tm * hidden * 4 + tm * tv * 4
    return io + w + temps


_TM_CANDIDATES = (1024, 512, 384, 256, 128, 64, 32, 16, 8)
_TK_CANDIDATES = (1024, 512, 256, 128)
_TV_CANDIDATES = (2048, 1024, 512, 256, 128)


def _select_layer_tiles(n_tok, hidden, inter, budget):
    """Prefer large tm (drives flops/weight-byte), then the largest tk that
    fits — matches the roofline knees on v5e/v6e/v7x under each VMEM budget."""
    tm_cap = _round_up(min(n_tok, _TM_CANDIDATES[0]), 8)
    tk_cap = _round_up(min(inter, _TK_CANDIDATES[0]), 128)
    tms = sorted({min(t, tm_cap) for t in _TM_CANDIDATES}, reverse=True)
    tks = sorted({min(t, tk_cap) for t in _TK_CANDIDATES}, reverse=True)
    for tm in tms:
        for tk in tks:
            if _layer_step_bytes(tm, tk, hidden) <= budget:
                return tm, tk
    return tms[-1], tks[-1]


def _select_head_tile(tm, hidden, vocab, budget, out_bytes):
    tv_cap = _round_up(min(vocab, _TV_CANDIDATES[0]), 128)
    tvs = sorted({min(t, tv_cap) for t in _TV_CANDIDATES}, reverse=True)
    for tv in tvs:
        if _head_step_bytes(tm, tv, hidden, out_bytes) <= budget:
            return tv
    return tvs[-1]


def _pretile_cols(w, t):
    """(in, out) -> (ceil(out/t), in, t): each (in, t) weight tile is contiguous
    in HBM (instead of a strided column slab of a row-major matrix). Zero-pads
    the out dim to a multiple of t (padding is mathematically inert here)."""
    d_in, d_out = w.shape
    d_pad = _round_up(d_out, t)
    if d_pad != d_out:
        w = jnp.pad(w, ((0, 0), (0, d_pad - d_out)))
    return w.reshape(d_in, d_pad // t, t).transpose(1, 0, 2)


def _layernorm_f32(x, w, b):
    # x: (tm, H) f32 ; w, b: (1, H) f32
    mean = jnp.mean(x, axis=-1, keepdims=True)
    var = jnp.mean((x - mean) ** 2, axis=-1, keepdims=True)
    return (x - mean) * jax.lax.rsqrt(var + LN_EPS) * w + b


# ----------------------------------------------------------------------------
# Kernels
# ----------------------------------------------------------------------------
def decoder_layer_kernel(x_ref, ln_w_ref, ln_b_ref, wg_ref, wu_ref, wd_ref,
                         o_ref, h_scratch, acc_ref):
    """One LlamaDecoderLayer over a token tile, intermediate dim tiled on grid
    axis 1:  out = x + down( silu(x_ln @ Wg) * (x_ln @ Wu) )."""
    k = pl.program_id(1)

    @pl.when(k == 0)
    def _():
        # LayerNorm once per token tile; cache in bf16 scratch for the MXU.
        x = x_ref[...].astype(jnp.float32)
        h = _layernorm_f32(x, ln_w_ref[...].astype(jnp.float32),
                           ln_b_ref[...].astype(jnp.float32))
        h_scratch[...] = h.astype(h_scratch.dtype)
        acc_ref[...] = jnp.zeros_like(acc_ref)

    h = h_scratch[...]                                          # (tm, H) bf16
    gate = jnp.dot(h, wg_ref[...], preferred_element_type=jnp.float32)
    up = jnp.dot(h, wu_ref[...], preferred_element_type=jnp.float32)
    inter = (gate * jax.lax.logistic(gate)) * up                # (tm, tk) f32
    acc_ref[...] += jnp.dot(inter.astype(wd_ref.dtype), wd_ref[...],
                            preferred_element_type=jnp.float32)

    @pl.when(k == pl.num_programs(1) - 1)
    def _():
        o_ref[...] = (acc_ref[...]
                      + x_ref[...].astype(jnp.float32)).astype(o_ref.dtype)


def final_head_kernel(x_ref, ln_w_ref, ln_b_ref, w_ref, b_ref, o_ref):
    """final_layer_norm + output Linear (with bias), vocab tiled on grid axis 1.
    LN is recomputed per vocab tile (cheap vs. the matmul), so there is no
    resident state and both grid axes are safely 'parallel' (v7x megacore)."""
    x = x_ref[...].astype(jnp.float32)
    h = _layernorm_f32(x, ln_w_ref[...].astype(jnp.float32),
                       ln_b_ref[...].astype(jnp.float32)).astype(w_ref.dtype)
    logits = jnp.dot(h, w_ref[...], preferred_element_type=jnp.float32)
    logits = logits + b_ref[...].astype(jnp.float32)
    o_ref[...] = logits.astype(o_ref.dtype)


# ----------------------------------------------------------------------------
# Pallas wrappers
# ----------------------------------------------------------------------------
def run_decoder_layer(x, ln_w, ln_b, wg_t, wu_t, wd, *, tm, tk, vmem_limit):
    n_pad, hidden = x.shape
    n_k = wg_t.shape[0]
    inter_pad = n_k * tk
    grid = (n_pad // tm, n_k)

    # Weights are re-streamed once per token tile.
    w_bytes = (wg_t.size + wu_t.size + wd.size) * wg_t.dtype.itemsize
    cost = pl.CostEstimate(
        flops=6 * n_pad * hidden * inter_pad,
        transcendentals=n_pad * inter_pad,
        bytes_accessed=(n_pad // tm) * w_bytes + 2 * x.size * x.dtype.itemsize)

    return pl.pallas_call(
        decoder_layer_kernel,
        out_shape=jax.ShapeDtypeStruct((n_pad, hidden), x.dtype),
        grid_spec=pltpu.PrefetchScalarGridSpec(
            num_scalar_prefetch=0,
            grid=grid,
            in_specs=[
                pl.BlockSpec((tm, hidden), lambda i, k: (i, 0)),            # x tile
                pl.BlockSpec((1, hidden), lambda i, k: (0, 0)),             # ln_w
                pl.BlockSpec((1, hidden), lambda i, k: (0, 0)),             # ln_b
                pl.BlockSpec((None, hidden, tk), lambda i, k: (k, 0, 0)),   # W_gate (contiguous tile)
                pl.BlockSpec((None, hidden, tk), lambda i, k: (k, 0, 0)),   # W_up   (contiguous tile)
                pl.BlockSpec((tk, hidden), lambda i, k: (k, 0)),            # W_down (row slab = contiguous)
            ],
            out_specs=pl.BlockSpec((tm, hidden), lambda i, k: (i, 0)),
            scratch_shapes=[
                pltpu.VMEM((tm, hidden), wg_t.dtype),    # cached LayerNorm(x) (bf16)
                pltpu.VMEM((tm, hidden), jnp.float32),   # f32 down-proj accumulator
            ],
        ),
        compiler_params=pltpu.CompilerParams(
            dimension_semantics=("parallel", "arbitrary"),
            vmem_limit_bytes=vmem_limit),
        cost_estimate=cost,
    )(x, ln_w, ln_b, wg_t, wu_t, wd)


def run_final_head(x, ln_w, ln_b, wo_t, b_out, *, tm, tv, out_dtype, vmem_limit):
    n_pad, hidden = x.shape
    n_v = wo_t.shape[0]
    vocab_pad = n_v * tv
    grid = (n_pad // tm, n_v)

    cost = pl.CostEstimate(
        flops=2 * n_pad * hidden * vocab_pad,
        transcendentals=0,
        bytes_accessed=(n_pad // tm) * wo_t.size * wo_t.dtype.itemsize
        + x.size * x.dtype.itemsize
        + n_pad * vocab_pad * jnp.dtype(out_dtype).itemsize)

    return pl.pallas_call(
        final_head_kernel,
        out_shape=jax.ShapeDtypeStruct((n_pad, vocab_pad), out_dtype),
        grid_spec=pltpu.PrefetchScalarGridSpec(
            num_scalar_prefetch=0,
            grid=grid,
            in_specs=[
                pl.BlockSpec((tm, hidden), lambda i, v: (i, 0)),            # x tile
                pl.BlockSpec((1, hidden), lambda i, v: (0, 0)),             # ln_w
                pl.BlockSpec((1, hidden), lambda i, v: (0, 0)),             # ln_b
                pl.BlockSpec((None, hidden, tv), lambda i, v: (v, 0, 0)),   # W_out (contiguous tile)
                pl.BlockSpec((1, tv), lambda i, v: (0, v)),                 # bias tile
            ],
            out_specs=pl.BlockSpec((tm, tv), lambda i, v: (i, v)),          # lane-dense
        ),
        compiler_params=pltpu.CompilerParams(
            dimension_semantics=("parallel", "parallel"),
            vmem_limit_bytes=vmem_limit),
        cost_estimate=cost,
    )(x, ln_w, ln_b, wo_t, b_out)


# ----------------------------------------------------------------------------
# Model
# ----------------------------------------------------------------------------
def init_llama_params(key, *, hidden_size, intermediate_size, num_layers,
                      vocab_size, dtype=jnp.bfloat16):
    params = {}
    keys = jax.random.split(key, 3 + 3 * num_layers)
    scale = 0.02
    params["embedding"] = (scale * jax.random.normal(
        keys[0], (vocab_size, hidden_size), jnp.float32)).astype(dtype)
    layers = []
    for l in range(num_layers):
        k_g, k_u, k_d = keys[1 + 3 * l: 4 + 3 * l]
        layers.append({
            "ln_w": jnp.ones((1, hidden_size), jnp.float32),
            "ln_b": jnp.zeros((1, hidden_size), jnp.float32),
            # gate_up_proj split into its two halves; stored (in, out): y = x @ W
            "w_gate": (scale * jax.random.normal(
                k_g, (hidden_size, intermediate_size), jnp.float32)).astype(dtype),
            "w_up": (scale * jax.random.normal(
                k_u, (hidden_size, intermediate_size), jnp.float32)).astype(dtype),
            "w_down": (scale * jax.random.normal(
                k_d, (intermediate_size, hidden_size), jnp.float32)).astype(dtype),
        })
    params["layers"] = layers
    params["final_ln_w"] = jnp.ones((1, hidden_size), jnp.float32)
    params["final_ln_b"] = jnp.zeros((1, hidden_size), jnp.float32)
    params["w_out"] = (scale * jax.random.normal(
        keys[-2], (hidden_size, vocab_size), jnp.float32)).astype(dtype)
    params["b_out"] = scale * jax.random.normal(
        keys[-1], (1, vocab_size), jnp.float32)
    return params


def llama_forward(params, input_ids, *, logits_dtype=jnp.float32):
    """input_ids: (B, S) int32 -> logits (B, S, V) in logits_dtype (f32 default;
    pass bf16 to halve the LM-head writeback for huge vocabularies)."""
    batch, seq = input_ids.shape
    vocab_size, hidden_size = params["embedding"].shape
    n_tok = batch * seq

    # TODO(synk): embedding gather stays in XLA (a data-dependent DMA gather in
    # Pallas buys nothing at these sizes).
    hidden = jnp.take(params["embedding"], input_ids.reshape(-1), axis=0)
    hidden = hidden.reshape(n_tok, hidden_size)

    inter = params["layers"][0]["w_gate"].shape[1]
    vmem_limit = _vmem_limit_bytes()
    budget = int(0.9 * vmem_limit)        # leave headroom for compiler scratch
    tm, tk = _select_layer_tiles(n_tok, hidden_size, inter, budget)
    tv = _select_head_tile(tm, hidden_size, vocab_size, budget,
                           jnp.dtype(logits_dtype).itemsize)

    # Pad the token dim to a multiple of tm (zero rows are sliced off again).
    n_pad = _round_up(n_tok, tm)
    if n_pad != n_tok:
        hidden = jnp.pad(hidden, ((0, n_pad - n_tok), (0, 0)))

    # TODO(synk): for small-batch decode on v7x the token axis has one tile and
    # only the 'arbitrary' k axis remains; splitting I across the two TCs with
    # partial outputs summed in XLA would recover ~2x latency there.
    for layer in params["layers"]:
        # Pre-tiled / zero-padded weight views. TODO(synk): in a real model
        # these reshapes happen once at weight-load time, not per forward.
        wg_t = _pretile_cols(layer["w_gate"], tk)
        wu_t = _pretile_cols(layer["w_up"], tk)
        inter_pad = wg_t.shape[0] * tk
        wd = layer["w_down"]
        if inter_pad != wd.shape[0]:
            wd = jnp.pad(wd, ((0, inter_pad - wd.shape[0]), (0, 0)))
        hidden = run_decoder_layer(hidden, layer["ln_w"], layer["ln_b"],
                                   wg_t, wu_t, wd, tm=tm, tk=tk,
                                   vmem_limit=vmem_limit)

    wo_t = _pretile_cols(params["w_out"], tv)
    vocab_pad = wo_t.shape[0] * tv
    b_out = params["b_out"]
    if vocab_pad != vocab_size:
        b_out = jnp.pad(b_out, ((0, 0), (0, vocab_pad - vocab_size)))

    logits = run_final_head(hidden, params["final_ln_w"], params["final_ln_b"],
                            wo_t, b_out, tm=tm, tv=tv,
                            out_dtype=logits_dtype, vmem_limit=vmem_limit)
    logits = logits[:n_tok, :vocab_size]
    return logits.reshape(batch, seq, vocab_size)


if __name__ == "__main__":
    # Small config (activation = "silu", as in the reference module).
    batch, seq = 2, 8
    hidden_size = 128
    intermediate_size = 256
    num_layers = 2
    vocab_size = 256

    key = jax.random.PRNGKey(0)
    k_params, k_ids = jax.random.split(key)
    params = init_llama_params(
        k_params,
        hidden_size=hidden_size,
        intermediate_size=intermediate_size,
        num_layers=num_layers,
        vocab_size=vocab_size,
    )
    input_ids = jax.random.randint(k_ids, (batch, seq), 0, vocab_size, jnp.int32)

    logits = llama_forward(params, input_ids)
    jax.block_until_ready(logits)
    assert logits.shape == (batch, seq, vocab_size)
    assert bool(jnp.all(jnp.isfinite(logits)))
    print("KERNEL_OK")
</pallas_src>

<mosaic_0001>
module attributes {stable_mosaic.version = 11 : i64} {
  func.func @decoder_layer_kernel(%arg0: i32, %arg1: i32, %arg2: memref<16x128xbf16, #tpu.memory_space<vmem>>, %arg3: memref<1x128xf32, #tpu.memory_space<vmem>>, %arg4: memref<1x128xf32, #tpu.memory_space<vmem>>, %arg5: memref<1x128x256xbf16, #tpu.memory_space<vmem>>, %arg6: memref<1x128x256xbf16, #tpu.memory_space<vmem>>, %arg7: memref<256x128xbf16, #tpu.memory_space<vmem>>, %arg8: memref<16x128xbf16, #tpu.memory_space<vmem>>, %arg9: memref<16x128xbf16, #tpu.memory_space<vmem>>, %arg10: memref<16x128xf32, #tpu.memory_space<vmem>>) attributes {dimension_semantics = [#tpu.dimension_semantics<parallel>, #tpu.dimension_semantics<arbitrary>], iteration_bounds = array<i64: 1, 1>, scalar_prefetch = 0 : i64, scratch_operands = 2 : i64, tpu.core_type = #tpu.core_type<tc>, window_params = [{transform_indices = @transform_0, window_bounds = array<i64: 16, 128>}, {pipeline_mode = #tpu.pipeline_mode<synchronous>, transform_indices = @transform_1, window_bounds = array<i64: 1, 128>}, {pipeline_mode = #tpu.pipeline_mode<synchronous>, transform_indices = @transform_2, window_bounds = array<i64: 1, 128>}, {transform_indices = @transform_3, window_bounds = array<i64: 1, 128, 256>}, {transform_indices = @transform_4, window_bounds = array<i64: 1, 128, 256>}, {transform_indices = @transform_5, window_bounds = array<i64: 256, 128>}, {transform_indices = @transform_6, window_bounds = array<i64: 16, 128>}]} {
    %c0_i32 = arith.constant 0 : i32
    %0 = arith.cmpi eq, %arg1, %c0_i32 : i32
    %1 = arith.extui %0 : i1 to i32
    %c0_i32_0 = arith.constant 0 : i32
    %2 = arith.cmpi ne, %1, %c0_i32_0 : i32
    scf.if %2 {
      %c0_19 = arith.constant 0 : index
      %c0_20 = arith.constant 0 : index
      %26 = vector.load %arg2[%c0_19, %c0_20] : memref<16x128xbf16, #tpu.memory_space<vmem>>, vector<16x128xbf16>
      %27 = arith.extf %26 : vector<16x128xbf16> to vector<16x128xf32>
      %c0_21 = arith.constant 0 : index
      %c0_22 = arith.constant 0 : index
      %28 = vector.load %arg3[%c0_21, %c0_22] : memref<1x128xf32, #tpu.memory_space<vmem>>, vector<1x128xf32>
      %c0_23 = arith.constant 0 : index
      %c0_24 = arith.constant 0 : index
      %29 = vector.load %arg4[%c0_23, %c0_24] : memref<1x128xf32, #tpu.memory_space<vmem>>, vector<1x128xf32>
      %cst_25 = arith.constant dense<0.000000e+00> : vector<16xf32>
      %30 = vector.multi_reduction <add>, %27, %cst_25 [1] : vector<16x128xf32> to vector<16xf32>
      %31 = vector.shape_cast %30 : vector<16xf32> to vector<16x1xf32>
      %cst_26 = arith.constant 1.280000e+02 : f32
      %32 = vector.broadcast %cst_26 : f32 to vector<16x1xf32>
      %33 = arith.divf %31, %32 : vector<16x1xf32>
      %34 = vector.broadcast %33 : vector<16x1xf32> to vector<16x128xf32>
      %35 = arith.subf %27, %34 : vector<16x128xf32>
      %36 = arith.mulf %35, %35 : vector<16x128xf32>
      %cst_27 = arith.constant dense<0.000000e+00> : vector<16xf32>
      %37 = vector.multi_reduction <add>, %36, %cst_27 [1] : vector<16x128xf32> to vector<16xf32>
      %38 = vector.shape_cast %37 : vector<16xf32> to vector<16x1xf32>
      %cst_28 = arith.constant 1.280000e+02 : f32
      %39 = vector.broadcast %cst_28 : f32 to vector<16x1xf32>
      %40 = arith.divf %38, %39 : vector<16x1xf32>
      %41 = vector.broadcast %33 : vector<16x1xf32> to vector<16x128xf32>
      %42 = arith.subf %27, %41 : vector<16x128xf32>
      %cst_29 = arith.constant 9.99999974E-6 : f32
      %43 = vector.broadcast %cst_29 : f32 to vector<16x1xf32>
      %44 = arith.addf %40, %43 : vector<16x1xf32>
      %45 = math.rsqrt %44 : vector<16x1xf32>
      %46 = vector.broadcast %45 : vector<16x1xf32> to vector<16x128xf32>
      %47 = arith.mulf %42, %46 : vector<16x128xf32>
      %48 = vector.broadcast %28 : vector<1x128xf32> to vector<16x128xf32>
      %49 = arith.mulf %47, %48 : vector<16x128xf32>
      %50 = vector.broadcast %29 : vector<1x128xf32> to vector<16x128xf32>
      %51 = arith.addf %49, %50 : vector<16x128xf32>
      %52 = arith.truncf %51 : vector<16x128xf32> to vector<16x128xbf16>
      %c0_30 = arith.constant 0 : index
      %c0_31 = arith.constant 0 : index
      %53 = vector.load %arg9[%c0_30, %c0_31] : memref<16x128xbf16, #tpu.memory_space<vmem>>, vector<16x128xbf16>
      tpu.vector_store %arg9[%c0_30, %c0_31], %52 {strides = array<i32>} : memref<16x128xbf16, #tpu.memory_space<vmem>>, vector<16x128xbf16>,
      %cst_32 = arith.constant 0.000000e+00 : f32
      %54 = vector.broadcast %cst_32 : f32 to vector<16x128xf32>
      %c0_33 = arith.constant 0 : index
      %c0_34 = arith.constant 0 : index
      %55 = vector.load %arg10[%c0_33, %c0_34] : memref<16x128xf32, #tpu.memory_space<vmem>>, vector<16x128xf32>
      tpu.vector_store %arg10[%c0_33, %c0_34], %54 {strides = array<i32>} : memref<16x128xf32, #tpu.memory_space<vmem>>, vector<16x128xf32>,
    } else {
    }
    %c0 = arith.constant 0 : index
    %c0_1 = arith.constant 0 : index
    %3 = vector.load %arg9[%c0, %c0_1] : memref<16x128xbf16, #tpu.memory_space<vmem>>, vector<16x128xbf16>
    %c0_2 = arith.constant 0 : index
    %c0_3 = arith.constant 0 : index
    %c0_4 = arith.constant 0 : index
    %4 = vector.load %arg5[%c0_2, %c0_3, %c0_4] : memref<1x128x256xbf16, #tpu.memory_space<vmem>>, vector<1x128x256xbf16>
    %5 = vector.shape_cast %4 : vector<1x128x256xbf16> to vector<128x256xbf16>
    %cst = arith.constant dense<0.000000e+00> : vector<16x256xf32>
    %6 = tpu.matmul %3, %5, %cst {dimension_numbers = #tpu.dot_dimension_numbers<[1], [0], [0], [1], [0, 0, 1, 1], [], []>} : vector<16x128xbf16>, vector<128x256xbf16>, vector<16x256xf32> -> vector<16x256xf32>
    %c0_5 = arith.constant 0 : index
    %c0_6 = arith.constant 0 : index
    %c0_7 = arith.constant 0 : index
    %7 = vector.load %arg6[%c0_5, %c0_6, %c0_7] : memref<1x128x256xbf16, #tpu.memory_space<vmem>>, vector<1x128x256xbf16>
    %8 = vector.shape_cast %7 : vector<1x128x256xbf16> to vector<128x256xbf16>
    %cst_8 = arith.constant dense<0.000000e+00> : vector<16x256xf32>
    %9 = tpu.matmul %3, %8, %cst_8 {dimension_numbers = #tpu.dot_dimension_numbers<[1], [0], [0], [1], [0, 0, 1, 1], [], []>} : vector<16x128xbf16>, vector<128x256xbf16>, vector<16x256xf32> -> vector<16x256xf32>
    %10 = arith.negf %6 : vector<16x256xf32>
    %11 = math.exp %10 : vector<16x256xf32>
    %cst_9 = arith.constant 1.000000e+00 : f32
    %12 = vector.broadcast %cst_9 : f32 to vector<16x256xf32>
    %13 = arith.addf %12, %11 : vector<16x256xf32>
    %14 = arith.divf %12, %13 : vector<16x256xf32>
    %15 = arith.mulf %6, %14 : vector<16x256xf32>
    %16 = arith.mulf %15, %9 : vector<16x256xf32>
    %c0_10 = arith.constant 0 : index
    %c0_11 = arith.constant 0 : index
    %17 = vector.load %arg10[%c0_10, %c0_11] : memref<16x128xf32, #tpu.memory_space<vmem>>, vector<16x128xf32>
    %18 = arith.truncf %16 : vector<16x256xf32> to vector<16x256xbf16>
    %c0_12 = arith.constant 0 : index
    %c0_13 = arith.constant 0 : index
    %19 = vector.load %arg7[%c0_12, %c0_13] : memref<256x128xbf16, #tpu.memory_space<vmem>>, vector<256x128xbf16>
    %cst_14 = arith.constant dense<0.000000e+00> : vector<16x128xf32>
    %20 = tpu.matmul %18, %19, %cst_14 {dimension_numbers = #tpu.dot_dimension_numbers<[1], [0], [0], [1], [0, 0, 1, 1], [], []>} : vector<16x256xbf16>, vector<256x128xbf16>, vector<16x128xf32> -> vector<16x128xf32>
    %21 = arith.addf %17, %20 : vector<16x128xf32>
    %c0_15 = arith.constant 0 : index
    %c0_16 = arith.constant 0 : index
    %22 = vector.load %arg10[%c0_15, %c0_16] : memref<16x128xf32, #tpu.memory_space<vmem>>, vector<16x128xf32>
    tpu.vector_store %arg10[%c0_15, %c0_16], %21 {strides = array<i32>} : memref<16x128xf32, #tpu.memory_space<vmem>>, vector<16x128xf32>,
    %c0_i32_17 = arith.constant 0 : i32
    %23 = arith.cmpi eq, %arg1, %c0_i32_17 : i32
    %24 = arith.extui %23 : i1 to i32
    %c0_i32_18 = arith.constant 0 : i32
    %25 = arith.cmpi ne, %24, %c0_i32_18 : i32
    scf.if %25 {
      %c0_19 = arith.constant 0 : index
      %c0_20 = arith.constant 0 : index
      %26 = vector.load %arg10[%c0_19, %c0_20] : memref<16x128xf32, #tpu.memory_space<vmem>>, vector<16x128xf32>
      %c0_21 = arith.constant 0 : index
      %c0_22 = arith.constant 0 : index
      %27 = vector.load %arg2[%c0_21, %c0_22] : memref<16x128xbf16, #tpu.memory_space<vmem>>, vector<16x128xbf16>
      %28 = arith.extf %27 : vector<16x128xbf16> to vector<16x128xf32>
      %29 = arith.addf %26, %28 : vector<16x128xf32>
      %30 = arith.truncf %29 : vector<16x128xf32> to vector<16x128xbf16>
      %c0_23 = arith.constant 0 : index
      %c0_24 = arith.constant 0 : index
      %31 = vector.load %arg8[%c0_23, %c0_24] : memref<16x128xbf16, #tpu.memory_space<vmem>>, vector<16x128xbf16>
      tpu.vector_store %arg8[%c0_23, %c0_24], %30 {strides = array<i32>} : memref<16x128xbf16, #tpu.memory_space<vmem>>, vector<16x128xbf16>,
    } else {
    }
    return
  }
  func.func @transform_0(%arg0: i32, %arg1: i32) -> (i32, i32) {
    %c0_i32 = arith.constant 0 : i32
    %c0_i32_0 = arith.constant 0 : i32
    return %arg0, %c0_i32 : i32, i32
  }
  func.func @transform_1(%arg0: i32, %arg1: i32) -> (i32, i32) {
    %c0_i32 = arith.constant 0 : i32
    %c0_i32_0 = arith.constant 0 : i32
    %c0_i32_1 = arith.constant 0 : i32
    return %c0_i32, %c0_i32_0 : i32, i32
  }
  func.func @transform_2(%arg0: i32, %arg1: i32) -> (i32, i32) {
    %c0_i32 = arith.constant 0 : i32
    %c0_i32_0 = arith.constant 0 : i32
    %c0_i32_1 = arith.constant 0 : i32
    return %c0_i32, %c0_i32_0 : i32, i32
  }
  func.func @transform_3(%arg0: i32, %arg1: i32) -> (i32, i32, i32) {
    %c0_i32 = arith.constant 0 : i32
    %c0_i32_0 = arith.constant 0 : i32
    %c0_i32_1 = arith.constant 0 : i32
    return %arg1, %c0_i32, %c0_i32_0 : i32, i32, i32
  }
  func.func @transform_4(%arg0: i32, %arg1: i32) -> (i32, i32, i32) {
    %c0_i32 = arith.constant 0 : i32
    %c0_i32_0 = arith.constant 0 : i32
    %c0_i32_1 = arith.constant 0 : i32
    return %arg1, %c0_i32, %c0_i32_0 : i32, i32, i32
  }
  func.func @transform_5(%arg0: i32, %arg1: i32) -> (i32, i32) {
    %c0_i32 = arith.constant 0 : i32
    %c0_i32_0 = arith.constant 0 : i32
    return %arg1, %c0_i32 : i32, i32
  }
  func.func @transform_6(%arg0: i32, %arg1: i32) -> (i32, i32) {
    %c0_i32 = arith.constant 0 : i32
    %c0_i32_0 = arith.constant 0 : i32
    return %arg0, %c0_i32 : i32, i32
  }
}

</mosaic_0001>

<bundles_post_ra>
// kernel: tpu_custom_call.1
= control target key start
LH: loop header
LB: loop body
LE: loop exit
PB: predicated region body
PF: predicated region fallthrough
CT: control target
= control target key end

     0   :  { %11 = vsyncpa [#allocation5], 0  ;;  %s1083_s0 = inlined_call_operand.hbm [shape: bf16[16,128], index: 0, kind: input, shape index: {}]   ;;  %s1084_s1 = inlined_call_operand.vmem [shape: f32[1,128], index: 1, kind: input, shape index: {}]   ;;  %s1085_s2 = inlined_call_operand.vmem [shape: f32[1,128], index: 2, kind: input, shape index: {}]   ;;  %s1086_s3 = inlined_call_operand.hbm [shape: bf16[1,128,256], index: 3, kind: input, shape index: {}]   ;;  %s1087_s4 = inlined_call_operand.hbm [shape: bf16[1,128,256], index: 4, kind: input, shape index: {}]   ;;  %s1088_s5 = inlined_call_operand.hbm [shape: bf16[256,128], index: 5, kind: input, shape index: {}]   ;;  %s1089_s6 = inlined_call_operand.hbm [shape: bf16[16,128], index: 6, kind: output, shape index: {}]  }
   0x1   :  { %12 = vsyncpa [#allocation8], 0 }
   0x2   :  { %13 = vsyncpa [#allocation11], 0 }
   0x3   :  { %14 = vsyncpa [#allocation6], 0  ;;  %s982_s21 = smov [#allocation7]  }
   0x4   :  { %s36_s22 = sshll.u32 %s982_s21, 4  ;;  %s37_s22 = int_to_ptr.vmem [resolvable:$true] %s36_s22 }
   0x5   :  { %s882_s23 = scalar_lea.vmem %s37_s22, 2048  ;;  %p887_p1 = scmp.lt.s32.totalorder %s37_s22, %s37_s22 }
   0x6   :  { %p883_p0 = scmp.ne.s32.totalorder %s37_s22, %s882_s23  ;;  %p888_p2 = scmp.lt.s32.totalorder %s882_s23, %s882_s23 }
   0x8   :  { %p889_p3 = por %p888_p2, %p887_p1 }
   0xa   :  { %p890_p4 = pnand %p889_p3, %p883_p0 }
   0xc   :  { %893 = shalt.err (!%p890_p4)
}
   0xd   :  { %s983_s24 = smov 128   ;;  %s984_s25 = smov 8  }
   0xe   :  { %42 = dma.hbm_to_vmem [thread:$0]  %s1086_s3, 2048, %s37_s22, [#allocation8], %s983_s24, %s983_s24, %s984_s25  }
   0xf   :  { %s985_s28 = smov [#allocation4]  }
  0x10   :  { %s20_s29 = sshll.u32 %s985_s28, 4  ;;  %s21_s29 = int_to_ptr.vmem [resolvable:$true] %s20_s29 }
  0x11   :  { %s902_s30 = scalar_lea.vmem %s21_s29, 128  ;;  %p907_p6 = scmp.lt.s32.totalorder %s21_s29, %s21_s29 }
  0x12   :  { %p903_p5 = scmp.ne.s32.totalorder %s21_s29, %s902_s30  ;;  %p908_p7 = scmp.lt.s32.totalorder %s902_s30, %s902_s30 }
  0x14   :  { %p909_p8 = por %p908_p7, %p907_p6 }
  0x16   :  { %p910_p9 = pnand %p909_p8, %p903_p5 }
  0x18   :  { %913 = shalt.err (!%p910_p9)
}
  0x19   :  { %s986_s7 = smov 64   ;;  %s987_s8 = smov 4  }
  0x1a   :  { %26 = dma.hbm_to_vmem [thread:$0]  %s1083_s0, 128, %s21_s29, [#allocation5], %s986_s7, %s986_s7, %s987_s8  }
  0x1b   :  { %s988_s3 = smov [#allocation9]   ;;  %s989_s12 = smov [#allocation10]  }
  0x1c   :  { %s48_s11 = sshll.u32 %s988_s3, 4  ;;  %s60_s13 = sshll.u32 %s989_s12, 4  ;;  %s49_s11 = int_to_ptr.vmem [resolvable:$true] %s48_s11  ;;  %s61_s13 = int_to_ptr.vmem [resolvable:$true] %s60_s13 }
  0x1d   :  { %s922_s14 = scalar_lea.vmem %s49_s11, 2048  ;;  %p927_p11 = scmp.lt.s32.totalorder %s49_s11, %s49_s11 }
  0x1e   :  { %p923_p10 = scmp.ne.s32.totalorder %s49_s11, %s922_s14  ;;  %p928_p12 = scmp.lt.s32.totalorder %s922_s14, %s922_s14 }
  0x20   :  { %p929_p13 = por %p928_p12, %p927_p11 }
  0x22   :  { %p930_p0 = pnand %p929_p13, %p923_p10 }
  0x24   :  { %933 = shalt.err (!%p930_p0)
}
  0x25   :  { %54 = dma.hbm_to_vmem [thread:$0]  %s1087_s4, 2048, %s49_s11, [#allocation8], %s983_s24, %s983_s24, %s984_s25  }
  0x26   :  { %s942_s0 = scalar_lea.vmem %s61_s13, 2048  ;;  %p947_p2 = scmp.lt.s32.totalorder %s61_s13, %s61_s13 }
  0x27   :  { %p943_p1 = scmp.ne.s32.totalorder %s61_s13, %s942_s0  ;;  %p948_p3 = scmp.lt.s32.totalorder %s942_s0, %s942_s0 }
  0x29   :  { %p949_p4 = por %p948_p3, %p947_p2 }
  0x2b   :  { %p950_p5 = pnand %p949_p4, %p943_p1 }
  0x2d   :  { %953 = shalt.err (!%p950_p5)
}
  0x2e   :  { %66 = dma.hbm_to_vmem [thread:$0]  %s1088_s5, 2048, %s61_s13, [#allocation11], %s986_s7, %s986_s7, %s987_s8  }
  0x2f   :  { %974 = dma.done.wait [#allocation5], 128  }
  0x30   :  { %975 = vsyncadd [#allocation5], 4294967168 }
  0x31   :  { %976 = dma.done.wait [#allocation8], 4096  }
  0x32   :  { %977 = vsyncadd [#allocation8], 4294963200 }
  0x33   :  { %978 = dma.done.wait [#allocation11], 2048  }
  0x34   :  { %979 = vsyncadd [#allocation11], 4294965248  ;;  %v740_v0 = vld [vmem:[#allocation4] sm:$0xff]   ;;  %v795_v15 = vld [vmem:[#allocation7 + $0x64] ss:$8 sps:$4 sm:$0xff]   ;;  %v990_v43 = vmov 0  }
  0x35   :  { %v1051_v1 = vunpack.c.l.bf16 %v740_v0  ;;  %v1054_v2 = vunpack.c.h.bf16 %v740_v0  ;;  %v789_v11 = vld [vmem:[#allocation7 + $0x74] ss:$8 sps:$4 sm:$0xff]   ;;  %v793_v13 = vld [vmem:[#allocation7 + $0x70] ss:$8 sps:$4 sm:$0xff]   ;;  %v797_v16 = vld [vmem:[#allocation9 + $0x64] ss:$8 sps:$4 sm:$0xff]   ;;  %277 = vmatprep.mubr.bf16.mxu0 %v990_v43  ;;  %416 = vmatprep.mubr.bf16.mxu1 %v990_v43 }
  0x36   :  { %v791_v12 = vld [vmem:[#allocation9 + $0x74] ss:$8 sps:$4 sm:$0xff]   ;;  %v794_v14 = vld [vmem:[#allocation9 + $0x70] ss:$8 sps:$4 sm:$0xff]   ;;  %245 = vmatprep.subr.bf16.mxu0 %v789_v11  ;;  %v799_v17 = vld [vmem:[#allocation7 + $0x60] ss:$8 sps:$4 sm:$0xff]  }
  0x37   :  { %90 = vadd.xlane.f32.xlu0 %v1051_v1  ;;  %384 = vmatprep.subr.bf16.mxu1 %v791_v12  ;;  %v800_v18 = vld [vmem:[#allocation9 + $0x60] ss:$8 sps:$4 sm:$0xff]   ;;  %v801_v19 = vld [vmem:[#allocation7 + $0x54] ss:$8 sps:$4 sm:$0xff]   ;;  %v805_v21 = vld [vmem:[#allocation7 + $0x50] ss:$8 sps:$4 sm:$0xff]  }
  0x38   :  { %246 = vmatpush1.bf16.msra.mxu0 %v793_v13  ;;  %385 = vmatpush1.bf16.msra.mxu1 %v794_v14  ;;  %v803_v20 = vld [vmem:[#allocation9 + $0x54] ss:$8 sps:$4 sm:$0xff]   ;;  %v806_v22 = vld [vmem:[#allocation9 + $0x50] ss:$8 sps:$4 sm:$0xff]   ;;  %v807_v23 = vld [vmem:[#allocation7 + $0x44] ss:$8 sps:$4 sm:$0xff]  }
  0x39   :  { %247 = vmatprep.subr.bf16.mxu0 %v795_v15  ;;  %386 = vmatprep.subr.bf16.mxu1 %v797_v16  ;;  %v809_v24 = vld [vmem:[#allocation9 + $0x44] ss:$8 sps:$4 sm:$0xff]   ;;  %v811_v25 = vld [vmem:[#allocation7 + $0x40] ss:$8 sps:$4 sm:$0xff]   ;;  %v813_v27 = vld [vmem:[#allocation7 + $0x34] ss:$8 sps:$4 sm:$0xff]  }
  0x3a   :  { %v812_v26 = vld [vmem:[#allocation9 + $0x40] ss:$8 sps:$4 sm:$0xff]   ;;  %v815_v28 = vld [vmem:[#allocation9 + $0x34] ss:$8 sps:$4 sm:$0xff]   ;;  %v817_v29 = vld [vmem:[#allocation7 + $0x30] ss:$8 sps:$4 sm:$0xff]  }
  0x3b   :  { %92 = vadd.xlane.f32.xlu0 %v1054_v2  ;;  %v818_v30 = vld [vmem:[#allocation9 + $0x30] ss:$8 sps:$4 sm:$0xff]   ;;  %v819_v31 = vld [vmem:[#allocation7 + $0x24] ss:$8 sps:$4 sm:$0xff]   ;;  %v823_v33 = vld [vmem:[#allocation7 + $0x20] ss:$8 sps:$4 sm:$0xff]  }
  0x3c   :  { %248 = vmatpush1.bf16.msra.mxu0 %v799_v17  ;;  %387 = vmatpush1.bf16.msra.mxu1 %v800_v18  ;;  %v821_v32 = vld [vmem:[#allocation9 + $0x24] ss:$8 sps:$4 sm:$0xff]   ;;  %v824_v34 = vld [vmem:[#allocation9 + $0x20] ss:$8 sps:$4 sm:$0xff]   ;;  %v825_v35 = vld [vmem:[#allocation7 + $0x14] ss:$8 sps:$4 sm:$0xff]  }
  0x3d   :  { %249 = vmatprep.subr.bf16.mxu0 %v801_v19  ;;  %388 = vmatprep.subr.bf16.mxu1 %v803_v20  ;;  %v827_v36 = vld [vmem:[#allocation9 + $0x14] ss:$8 sps:$4 sm:$0xff]   ;;  %v829_v37 = vld [vmem:[#allocation7 + $0x10] ss:$8 sps:$4 sm:$0xff]   ;;  %v831_v39 = vld [vmem:[#allocation7 + $0x4] ss:$8 sps:$4 sm:$0xff]  }
  0x3e   :  { %v830_v38 = vld [vmem:[#allocation9 + $0x10] ss:$8 sps:$4 sm:$0xff]   ;;  %v833_v40 = vld [vmem:[#allocation9 + $0x4] ss:$8 sps:$4 sm:$0xff]   ;;  %v835_v41 = vld [vmem:[#allocation7] ss:$8 sps:$4 sm:$0xff]  }
  0x3f   :  { %v836_v42 = vld [vmem:[#allocation9] ss:$8 sps:$4 sm:$0xff]   ;;  %v676_v52 = vld [vmem:[%s1084_s1] ss:$0 sm:$0xff]  ;;  %v838_v62 = vld [vmem:[#allocation10 + $0x78] sm:$0xff]   ;;  %s991_s1 = smov [#allocation12]  }
  0x40   :  { %250 = vmatpush1.bf16.msra.mxu0 %v805_v21  ;;  %389 = vmatpush1.bf16.msra.mxu1 %v806_v22  ;;  %v677_v56 = vld [vmem:[%s1085_s2] ss:$0 sm:$0xff]  ;;  %v839_v63 = vld [vmem:[#allocation10 + $0x38] sm:$0xff]   ;;  %v850_v12 = vld [vmem:[#allocation10 + $0x48] sm:$0xff]   ;;  %s662_s2 = sshll.u32 %s991_s1, 4  ;;  %s663_s2 = int_to_ptr.vmem [resolvable:$true] %s662_s2 }
  0x41   :  { %251 = vmatprep.subr.bf16.mxu0 %v807_v23  ;;  %390 = vmatprep.subr.bf16.mxu1 %v809_v24  ;;  %v840_v0 = vld [vmem:[#allocation10 + $0x70] sm:$0xff]   ;;  %v851_v13 = vld [vmem:[#allocation10 + $0x8] sm:$0xff]   ;;  %v852_v14 = vld [vmem:[#allocation10 + $0x40] sm:$0xff]   ;;  %s954_s21 = scalar_lea.vmem %s663_s2, 128  ;;  %p959_p7 = scmp.lt.s32.totalorder %s663_s2, %s663_s2 }
  0x42   :  { %v849_v11 = vld [vmem:[#allocation10 + $0x10] sm:$0xff]   ;;  %v853_v15 = vld [vmem:[#allocation10] sm:$0xff]   ;;  %p955_p6 = scmp.ne.s32.totalorder %s663_s2, %s954_s21  ;;  %p960_p8 = scmp.lt.s32.totalorder %s954_s21, %s954_s21 }
  0x44   :  { %252 = vmatpush1.bf16.msra.mxu0 %v811_v25  ;;  %391 = vmatpush1.bf16.msra.mxu1 %v812_v26  ;;  %p961_p9 = por %p960_p8, %p959_p7 }
  0x45   :  { %253 = vmatprep.subr.bf16.mxu0 %v813_v27  ;;  %392 = vmatprep.subr.bf16.mxu1 %v815_v28 }
  0x46   :  { %p962_p10 = pnand %p961_p9, %p955_p6 }
  0x48   :  { %254 = vmatpush1.bf16.msra.mxu0 %v817_v29  ;;  %393 = vmatpush1.bf16.msra.mxu1 %v818_v30 }
  0x49   :  { %255 = vmatprep.subr.bf16.mxu0 %v819_v31  ;;  %394 = vmatprep.subr.bf16.mxu1 %v821_v32 }
  0x4c   :  { %256 = vmatpush1.bf16.msra.mxu0 %v823_v33  ;;  %395 = vmatpush1.bf16.msra.mxu1 %v824_v34 }
  0x4d   :  { %257 = vmatprep.subr.bf16.mxu0 %v825_v35  ;;  %396 = vmatprep.subr.bf16.mxu1 %v827_v36 }
  0x50   :  { %258 = vmatpush1.bf16.msra.mxu0 %v829_v37  ;;  %397 = vmatpush1.bf16.msra.mxu1 %v830_v38 }
  0x51   :  { %259 = vmatprep.subr.bf16.mxu0 %v831_v39  ;;  %398 = vmatprep.subr.bf16.mxu1 %v833_v40 }
  0x54   :  { %260 = vmatpush1.bf16.msra.mxu0 %v835_v41  ;;  %399 = vmatpush1.bf16.msra.mxu1 %v836_v42 }
  0x55   :  { %757 = vmatprep.subr.bf16.mxu0 %v838_v62 }
  0xc0   :  { %v91_v3 = vpop.xlane.xlu0 %90 }
  0xc1   :  { %v95_v4 = vmul.f32 0.0078125, %v91_v3  ;;  %v841_v3 = vld [vmem:[#allocation10 + $0x30] sm:$0xff]  }
  0xc3   :  { %v1058_v5 = vsub.f32 %v1051_v1, %v95_v4  ;;  %v842_v4 = vld [vmem:[#allocation10 + $0x68] sm:$0xff]  }
  0xc4   :  { %v93_v6 = vpop.xlane.xlu0 %92 }
  0xc5   :  { %v96_v7 = vmul.f32 0.0078125, %v93_v6  ;;  %v99_v8 = vmul.f32 %v1058_v5, %v1058_v5  ;;  %v844_v6 = vld [vmem:[#allocation10 + $0x60] sm:$0xff]  }
  0xc7   :  { %v1063_v9 = vsub.f32 %v1054_v2, %v96_v7  ;;  %101 = vadd.xlane.f32.xlu1 %v99_v8  ;;  %v845_v7 = vld [vmem:[#allocation10 + $0x20] sm:$0xff]   ;;  %v846_v8 = vld [vmem:[#allocation10 + $0x58] sm:$0xff]  }
  0xc9   :  { %v100_v10 = vmul.f32 %v1063_v9, %v1063_v9 }
  0xcb   :  { %103 = vadd.xlane.f32.xlu1 %v100_v10  ;;  %v848_v10 = vld [vmem:[#allocation10 + $0x50] sm:$0xff]  }
 0x150   :  { %v102_v44 = vpop.xlane.xlu1 %101 }
 0x151   :  { %v105_v45 = vmul.f32 0.0078125, %v102_v44 }
 0x153   :  { %v107_v46 = vadd.f32 1e-05, %v105_v45 }
 0x154   :  { %v104_v47 = vpop.xlane.xlu1 %103 }
 0x155   :  { %854 = vrsqrt.f32 %v107_v46  ;;  %v106_v48 = vmul.f32 0.0078125, %v104_v47 }
 0x157   :  { %v108_v49 = vadd.f32 1e-05, %v106_v48 }
 0x159   :  { %856 = vrsqrt.f32 %v108_v49 }
 0x162   :  { %v855_v50 = vpop.eup %854 }
 0x163   :  { %v111_v51 = vmul.f32 %v855_v50, %v1058_v5  ;;  %v843_v5 = vld [vmem:[#allocation10 + $0x28] sm:$0xff]  }
 0x165   :  { %v119_v54 = vmul.f32 %v676_v52, %v111_v51 }
 0x166   :  { %v857_v53 = vpop.eup %856 }
 0x167   :  { %v112_v55 = vmul.f32 %v857_v53, %v1063_v9  ;;  %v127_v58 = vadd.f32 %v677_v56, %v119_v54  ;;  %v847_v9 = vld [vmem:[#allocation10 + $0x18] sm:$0xff]  }
 0x169   :  { %v120_v57 = vmul.f32 %v676_v52, %v112_v55 }
 0x16b   :  { %v128_v59 = vadd.f32 %v677_v56, %v120_v57 }
 0x16d   :  { %v746_v60 = vpack.c.bf16 %v128_v59, %v127_v58 }
 0x16f   :  { %747 = vst [vmem:[#allocation2] sm:$0xff] %v746_v60  }
 0x176   :  { %v837_v61 = vld [vmem:[#allocation2] sm:$0xff]  }
 0x177   :  { %278 = vmatmul.mubr.bf16.vlgmr.msra.gmra.mxu0 %v837_v61  ;;  %417 = vmatmul.mubr.bf16.vlgmr.msra.gmra.mxu1 %v837_v61 }
 0x178   :  { %758 = vmatpush3.bf16.msra.mxu0 %v839_v63 }
 0x179   :  { %759 = vmatprep.subr.bf16.mxu0 %v840_v0 }
 0x17c   :  { %760 = vmatpush3.bf16.msra.mxu0 %v841_v3 }
 0x17d   :  { %761 = vmatprep.subr.bf16.mxu0 %v842_v4 }
 0x180   :  { %762 = vmatpush3.bf16.msra.mxu0 %v843_v5 }
 0x181   :  { %763 = vmatprep.subr.bf16.mxu0 %v844_v6 }
 0x184   :  { %764 = vmatpush3.bf16.msra.mxu0 %v845_v7 }
 0x185   :  { %765 = vmatprep.subr.bf16.mxu0 %v846_v8 }
 0x188   :  { %766 = vmatpush3.bf16.msra.mxu0 %v847_v9 }
 0x189   :  { %767 = vmatprep.subr.bf16.mxu0 %v848_v10 }
 0x18c   :  { %768 = vmatpush3.bf16.msra.mxu0 %v849_v11 }
 0x18d   :  { %769 = vmatprep.subr.bf16.mxu0 %v850_v12 }
 0x190   :  { %770 = vmatpush3.bf16.msra.mxu0 %v851_v13 }
 0x191   :  { %771 = vmatprep.subr.bf16.mxu0 %v852_v14 }
 0x194   :  { %772 = vmatpush3.bf16.msra.mxu0 %v853_v15 }
 0x237   :  { %v279_v16 = vpop.f32.mrf.mxu0  ;;  %v418_v32 = vpop.f32.mrf.mxu1 }
 0x238   :  { %v713_v17 = vmul.f32 -1.442695, %v279_v16 }
 0x239   :  { %v281_v18 = vpop.f32.mrf.mxu0  ;;  %v420_v33 = vpop.f32.mrf.mxu1 }
 0x23a   :  { %858 = vpow2.f32 %v713_v17  ;;  %v714_v19 = vmul.f32 -1.442695, %v281_v18 }
 0x23b   :  { %v283_v20 = vpop.f32.mrf.mxu0  ;;  %v422_v37 = vpop.f32.mrf.mxu1 }
 0x23c   :  { %860 = vpow2.f32 %v714_v19  ;;  %v715_v21 = vmul.f32 -1.442695, %v283_v20 }
 0x23d   :  { %v285_v22 = vpop.f32.mrf.mxu0  ;;  %v424_v44 = vpop.f32.mrf.mxu1 }
 0x23e   :  { %862 = vpow2.f32 %v715_v21  ;;  %v716_v23 = vmul.f32 -1.442695, %v285_v22 }
 0x240   :  { %864 = vpow2.f32 %v716_v23 }
 0x247   :  { %v859_v24 = vpop.eup %858 }
 0x248   :  { %v439_v26 = vadd.f32 1.0, %v859_v24 }
 0x249   :  { %v861_v25 = vpop.eup %860 }
 0x24a   :  { %v440_v27 = vadd.f32 1.0, %v861_v25 }
 0x24b   :  { %v863_v28 = vpop.eup %862 }
 0x24c   :  { %866 = vrcp.f32 %v440_v27  ;;  %v441_v29 = vadd.f32 1.0, %v863_v28 }
 0x24d   :  { %v865_v30 = vpop.eup %864  ;;  %868 = vrcp.f32 %v439_v26 }
 0x24e   :  { %870 = vrcp.f32 %v441_v29  ;;  %v442_v31 = vadd.f32 1.0, %v865_v30 }
 0x250   :  { %872 = vrcp.f32 %v442_v31 }
 0x259   :  { %v867_v34 = vpop.eup %866 }
 0x25a   :  { %v869_v35 = vpop.eup %868  ;;  %v452_v38 = vmul.f32 %v867_v34, %v281_v18 }
 0x25b   :  { %v871_v36 = vpop.eup %870  ;;  %v451_v41 = vmul.f32 %v869_v35, %v279_v16 }
 0x25c   :  { %v453_v39 = vmul.f32 %v871_v36, %v283_v20  ;;  %v456_v45 = vmul.f32 %v452_v38, %v420_v33 }
 0x25d   :  { %v873_v40 = vpop.eup %872  ;;  %v455_v47 = vmul.f32 %v451_v41, %v418_v32 }
 0x25e   :  { %v454_v42 = vmul.f32 %v873_v40, %v285_v22  ;;  %v457_v43 = vmul.f32 %v453_v39, %v422_v37 }
 0x260   :  { %v458_v46 = vmul.f32 %v454_v42, %v424_v44  ;;  %v461_v49 = vpack.c.bf16 %v457_v43, %v455_v47 }
 0x262   :  { %v462_v48 = vpack.c.bf16 %v458_v46, %v456_v45 }
 0x264   :  { %623 = vmatprep.mubr.bf16.mxu0 %v462_v48 }
 0x265   :  { %624 = vmatmul.mubr.bf16.vlgmr.msra.gmra.mxu0 %v461_v49 }
 0x325   :  { %v773_v50 = vpop.f32.mrf.mxu0 }
 0x327   :  { %v774_v51 = vpop.f32.mrf.mxu0 }
 0x328   :  { %v775_v53 = vadd.f32 %v774_v51, %v773_v50 }
 0x329   :  { %v776_v52 = vpop.f32.mrf.mxu0 }
 0x32a   :  { %v645_v56 = vadd.f32 %v775_v53, %v1051_v1 }
 0x32b   :  { %v777_v54 = vpop.f32.mrf.mxu0 }
 0x32c   :  { %v778_v55 = vadd.f32 %v777_v54, %v776_v52 }
 0x32e   :  { %v646_v57 = vadd.f32 %v778_v55, %v1054_v2 }
 0x330   :  { %v755_v58 = vpack.c.bf16 %v646_v57, %v645_v56 }
 0x332   :  { %756 = vst [vmem:[#allocation12] sm:$0xff] %v755_v58  }
 0x333   :  { %965 = shalt.err (!%p962_p10)
}
 0x334   :  { %668 = dma.vmem_to_hbm [thread:$0]  %s663_s2, 128, %s1089_s6, [#allocation6], %s986_s7, %s986_s7, %s987_s8  }
 0x335   :  { %980 = dma.done.wait [#allocation6], 128  }
 0x336   :  { %981 = vsyncadd [#allocation6], 4294967168 }
 0x337   :  { %672 = vsyncpa [#allocation5], 1 }
 0x338   :  { %673 = vsyncpa [#allocation8], 1 }
 0x339   :  { %674 = vsyncpa [#allocation11], 1 }
 0x33a   :  { %675 = vsyncpa [#allocation6], 1 }

</bundles_post_ra>
